<compile_context>
chip_gen: v7x
topology: tpu7x:2x2x1
jax: 0.10.0
libtpu: 0.0.40
codegen_flags: <defaults>
</compile_context>

<pallas_src>
import functools

import jax
import jax.numpy as jnp
from jax.experimental import pallas as pl
from jax.experimental.pallas import tpu as pltpu


# ----------------------------------------------------------------------------
# helpers
# ----------------------------------------------------------------------------
def _round_up(n, m):
    return ((n + m - 1) // m) * m


def _cdiv(a, b):
    return -(-a // b)


def _pad2(a, rows, cols):
    return jnp.pad(a, ((0, rows - a.shape[0]), (0, cols - a.shape[1])))


def _choose_tiling(B):
    """Pick (TB, Bp): sublane-aligned batch tile and padded batch.

    - tiles capped at 512 rows (85%+ of HBM roofline per measured data),
    - >= 2 grid steps whenever B allows (v7x megacore sharding),
    - per-tile rounding waste < 8 rows (no near-whole-tile padding).
    """
    B8 = _round_up(B, 8)
    if B8 <= 8:
        return B8, B8
    n_tiles = max(2, _cdiv(B8, 512))
    TB = _round_up(_cdiv(B8, n_tiles), 8)
    Bp = TB * n_tiles
    return TB, Bp


# ----------------------------------------------------------------------------
# Fused Pallas kernel: encoder(X1), encoder(X2), predictor([S1 ⊲ S2])
# ----------------------------------------------------------------------------
def _fused_kernel(x1_ref, x2_ref,
                  ew1_ref, eb1_ref, ew2_ref, eb2_ref,
                  pw1a_ref, pw1b_ref, pb1_ref, pw2_ref, pb2_ref,
                  s1_ref, s2_ref, y_ref):
    bf = jnp.bfloat16

    ew1 = ew1_ref[...]
    ew2 = ew2_ref[...]
    eb1 = eb1_ref[...]
    eb2 = eb2_ref[...]

    # ---- encoder on both pair halves (separate dots; no concat copies) ------
    x1 = x1_ref[...].astype(bf)                                   # (tb, Din)
    x2 = x2_ref[...].astype(bf)

    h1 = jnp.maximum(jnp.dot(x1, ew1, preferred_element_type=jnp.float32) + eb1, 0.0)
    h2 = jnp.maximum(jnp.dot(x2, ew1, preferred_element_type=jnp.float32) + eb1, 0.0)

    s1 = jnp.dot(h1.astype(bf), ew2, preferred_element_type=jnp.float32) + eb2
    s2 = jnp.dot(h2.astype(bf), ew2, preferred_element_type=jnp.float32) + eb2

    s1_ref[...] = s1.astype(s1_ref.dtype)                         # bf16 writeback
    s2_ref[...] = s2.astype(s2_ref.dtype)

    # ---- predictor on VMEM-resident activations -----------------------------
    # pw1a/pw1b rows are pre-permuted so that dot(s1, pw1a) + dot(s2, pw1b) is
    # exactly predictor-L1 on torch's flatten of transpose(S_pairs, 1, 3) —
    # the stack/transpose/flatten costs zero data movement here.
    ph = jnp.dot(s1.astype(bf), pw1a_ref[...], preferred_element_type=jnp.float32)
    ph = ph + jnp.dot(s2.astype(bf), pw1b_ref[...], preferred_element_type=jnp.float32)
    ph = jnp.maximum(ph + pb1_ref[...], 0.0)                      # (tb, PH) f32

    z = jnp.dot(ph.astype(bf), pw2_ref[...],
                preferred_element_type=jnp.float32) + pb2_ref[...]  # (tb, 128)
    y_ref[...] = jax.nn.sigmoid(z).astype(y_ref.dtype)            # lane-dense store


def _fused_pallas(x1, x2, kp, tb):
    Bp, Din = x1.shape
    HID = kp["ew1"].shape[1]
    CL = kp["ew2"].shape[1]
    PH = kp["pw1a"].shape[1]

    def row_blk(shape):                       # activation tiles: march over batch
        return pl.BlockSpec(shape, lambda i: (i, 0))

    def full_blk(shape):                      # weights: same block every step -> resident
        return pl.BlockSpec(shape, lambda i: (0, 0))

    out_shape = (jax.ShapeDtypeStruct((Bp, CL), jnp.bfloat16),
                 jax.ShapeDtypeStruct((Bp, CL), jnp.bfloat16),
                 jax.ShapeDtypeStruct((Bp, 128), jnp.bfloat16))

    # Advisory cost estimate for XLA's scheduler around the custom call.
    flops = (2 * (2 * Bp * Din * HID)         # encoder L1 (both halves)
             + 2 * (2 * Bp * HID * CL)        # encoder L2 (both halves)
             + 2 * (2 * Bp * CL * PH)         # predictor L1 (split K)
             + 2 * Bp * PH * 128)             # predictor head (padded lanes)
    weight_bytes = 2 * (Din * HID + HID * CL + 2 * CL * PH + PH * 128) \
        + 4 * (HID + CL + PH + 128)
    bytes_accessed = 2 * Bp * Din * 4 + 3 * Bp * 128 * 2 + weight_bytes
    cost = pl.CostEstimate(flops=flops, transcendentals=Bp * 128,
                           bytes_accessed=bytes_accessed)

    return pl.pallas_call(
        _fused_kernel,
        out_shape=out_shape,
        grid_spec=pltpu.PrefetchScalarGridSpec(
            num_scalar_prefetch=0,
            grid=(Bp // tb,),
            in_specs=[
                row_blk((tb, Din)), row_blk((tb, Din)),
                full_blk((Din, HID)), full_blk((1, HID)),
                full_blk((HID, CL)), full_blk((1, CL)),
                full_blk((CL, PH)), full_blk((CL, PH)), full_blk((1, PH)),
                full_blk((PH, 128)), full_blk((1, 128)),
            ],
            out_specs=[row_blk((tb, CL)), row_blk((tb, CL)), row_blk((tb, 128))],
        ),
        compiler_params=pltpu.CompilerParams(
            dimension_semantics=("parallel",),
            vmem_limit_bytes=32 * 1024 * 1024),
        cost_estimate=cost,
    )(x1, x2,
      kp["ew1"], kp["eb1"], kp["ew2"], kp["eb2"],
      kp["pw1a"], kp["pw1b"], kp["pb1"], kp["pw2"], kp["pb2"])


# ----------------------------------------------------------------------------
# EncoderTrainer forward
# ----------------------------------------------------------------------------
@functools.partial(jax.jit, static_argnames=("C", "L"))
def encoder_trainer_forward(X_pairs, kp, C, L):
    """X_pairs: (B, 2, D_in) float32.  Returns (y, S1, S2) — torch semantics."""
    B = X_pairs.shape[0]
    TB, Bp = _choose_tiling(B)

    # Row-pad only (no D padding, no host-side bf16 copy): kernel casts in VMEM.
    X1 = jnp.pad(X_pairs[:, 0, :], ((0, Bp - B), (0, 0)))
    X2 = jnp.pad(X_pairs[:, 1, :], ((0, Bp - B), (0, 0)))

    s1p, s2p, yp = _fused_pallas(X1, X2, kp, TB)

    S1 = s1p[:B].reshape(B, C, L).astype(jnp.float32)
    S2 = s2p[:B].reshape(B, C, L).astype(jnp.float32)
    y = yp[:B, :1].astype(jnp.float32)
    # NOTE: predictor is frozen (requires_grad=False) in torch; that is a
    # training-only property and has no effect on this forward pass.
    return y, S1, S2


# ----------------------------------------------------------------------------
# Parameters: original (torch-layout) params + one-time kernel preparation
# ----------------------------------------------------------------------------
def make_params(key, d_in, hid, C, L, pred_hid):
    """Original-layout synthetic encoder / predictor parameters (f32)."""
    k = jax.random.split(key, 8)
    scale = 0.05
    enc = {
        "w1": scale * jax.random.normal(k[0], (d_in, hid), jnp.float32),
        "b1": scale * jax.random.normal(k[1], (1, hid), jnp.float32),
        "w2": scale * jax.random.normal(k[2], (hid, C * L), jnp.float32),
        "b2": scale * jax.random.normal(k[3], (1, C * L), jnp.float32),
    }
    flat = L * C * 2                                   # predictor flattens (L, C, 2)
    pred = {
        "w1": scale * jax.random.normal(k[4], (flat, pred_hid), jnp.float32),
        "b1": scale * jax.random.normal(k[5], (1, pred_hid), jnp.float32),
        "w2": scale * jax.random.normal(k[6], (pred_hid, 1), jnp.float32),
        "b2": scale * jax.random.normal(k[7], (1, 1), jnp.float32),
    }
    return enc, pred


def prepare_kernel_params(enc, pred, d_in, C, L):
    """One-time (frozen) prep:
       * absorb stack+transpose(1,3)+flatten into a row permutation of
         predictor w1, then split it into the S1-half and S2-half,
       * pad predictor w2/b2 to 128 output lanes (unmasked full-lane stores),
       * cast matmul weights to bf16 (biases stay f32 — added post-accumulate)."""
    CL = C * L
    ph = pred["w1"].shape[1]

    # torch flatten order of (L, C, 2): f = (l*C + c)*2 + p
    # kernel feature order [S1_flat | S2_flat]:  g = p*C*L + c*L + l
    p_idx = jnp.arange(2)[:, None, None]
    c_idx = jnp.arange(C)[None, :, None]
    l_idx = jnp.arange(L)[None, None, :]
    perm = ((l_idx * C + c_idx) * 2 + p_idx).reshape(-1)     # perm[g] = f
    pw1_perm = pred["w1"][perm, :]                           # (2*CL, PH)

    return {
        "ew1": enc["w1"].astype(jnp.bfloat16),               # (d_in, hid), unpadded
        "eb1": enc["b1"].astype(jnp.float32),
        "ew2": enc["w2"].astype(jnp.bfloat16),
        "eb2": enc["b2"].astype(jnp.float32),
        "pw1a": pw1_perm[:CL].astype(jnp.bfloat16),          # multiplies S1_flat
        "pw1b": pw1_perm[CL:].astype(jnp.bfloat16),          # multiplies S2_flat
        "pb1": pred["b1"].astype(jnp.float32),
        "pw2": _pad2(pred["w2"], ph, 128).astype(jnp.bfloat16),  # lane-dense head
        "pb2": _pad2(pred["b2"], 1, 128).astype(jnp.float32),
    }


# ----------------------------------------------------------------------------
# Pure-JAX reference of the ORIGINAL formulation (stack + transpose(1,3))
# ----------------------------------------------------------------------------
def reference_forward(X_pairs, enc, pred, C, L):
    bf = jnp.bfloat16

    def encode(x):
        h = jnp.dot(x.astype(bf), enc["w1"].astype(bf),
                    preferred_element_type=jnp.float32) + enc["b1"]
        h = jnp.maximum(h, 0.0)
        s = jnp.dot(h.astype(bf), enc["w2"].astype(bf),
                    preferred_element_type=jnp.float32) + enc["b2"]
        return s.reshape(x.shape[0], C, L)

    S1 = encode(X_pairs[:, 0, :])
    S2 = encode(X_pairs[:, 1, :])
    S_pairs = jnp.stack([S1, S2], axis=1)                 # (B, 2, C, L)
    S_pairs = jnp.transpose(S_pairs, (0, 3, 2, 1))        # torch.transpose(1, 3)
    p = S_pairs.reshape(S_pairs.shape[0], -1)
    h = jnp.maximum(jnp.dot(p.astype(bf), pred["w1"].astype(bf),
                            preferred_element_type=jnp.float32) + pred["b1"], 0.0)
    z = jnp.dot(h.astype(bf), pred["w2"].astype(bf),
                preferred_element_type=jnp.float32) + pred["b2"]
    return jax.nn.sigmoid(z), S1, S2


# ----------------------------------------------------------------------------
# Main
# ----------------------------------------------------------------------------
if __name__ == "__main__":
    B, D_IN, HID, C, L, PRED_HID = 2, 32, 128, 8, 16, 128   # C*L = 128 (lane-dense)

    key = jax.random.PRNGKey(0)
    k_x, k_p = jax.random.split(key)
    enc_params, pred_params = make_params(k_p, D_IN, HID, C, L, PRED_HID)
    kernel_params = prepare_kernel_params(enc_params, pred_params, D_IN, C, L)

    X_pairs = jax.random.normal(k_x, (B, 2, D_IN), jnp.float32)

    y, S1, S2 = encoder_trainer_forward(X_pairs, kernel_params, C=C, L=L)
    jax.block_until_ready((y, S1, S2))

    assert y.shape == (B, 1)
    assert S1.shape == (B, C, L)
    assert S2.shape == (B, C, L)
    assert bool(jnp.all(jnp.isfinite(y)))

    # Correctness vs. the original stack/transpose formulation (same bf16 math;
    # kernel S1/S2/y are bf16-stored, so compare with matching tolerance).
    y_ref, S1_ref, S2_ref = reference_forward(X_pairs, enc_params, pred_params, C, L)
    assert bool(jnp.allclose(S1, S1_ref, rtol=2e-2, atol=2e-2))
    assert bool(jnp.allclose(S2, S2_ref, rtol=2e-2, atol=2e-2))
    assert bool(jnp.allclose(y, y_ref, rtol=2e-2, atol=2e-2))

    print("KERNEL_OK")
</pallas_src>

<mosaic_0001>
module attributes {stable_mosaic.version = 11 : i64} {
  func.func @_fused_kernel(%arg0: i32, %arg1: memref<8x32xf32, #tpu.memory_space<vmem>>, %arg2: memref<8x32xf32, #tpu.memory_space<vmem>>, %arg3: memref<32x128xbf16, #tpu.memory_space<vmem>>, %arg4: memref<1x128xf32, #tpu.memory_space<vmem>>, %arg5: memref<128x128xbf16, #tpu.memory_space<vmem>>, %arg6: memref<1x128xf32, #tpu.memory_space<vmem>>, %arg7: memref<128x128xbf16, #tpu.memory_space<vmem>>, %arg8: memref<128x128xbf16, #tpu.memory_space<vmem>>, %arg9: memref<1x128xf32, #tpu.memory_space<vmem>>, %arg10: memref<128x128xbf16, #tpu.memory_space<vmem>>, %arg11: memref<1x128xf32, #tpu.memory_space<vmem>>, %arg12: memref<8x128xbf16, #tpu.memory_space<vmem>>, %arg13: memref<8x128xbf16, #tpu.memory_space<vmem>>, %arg14: memref<8x128xbf16, #tpu.memory_space<vmem>>) attributes {dimension_semantics = [#tpu.dimension_semantics<parallel>], iteration_bounds = array<i64: 1>, scalar_prefetch = 0 : i64, scratch_operands = 0 : i64, tpu.core_type = #tpu.core_type<tc>, window_params = [{transform_indices = @transform_0, window_bounds = array<i64: 8, 32>}, {transform_indices = @transform_1, window_bounds = array<i64: 8, 32>}, {pipeline_mode = #tpu.pipeline_mode<synchronous>, transform_indices = @transform_2, window_bounds = array<i64: 32, 128>}, {pipeline_mode = #tpu.pipeline_mode<synchronous>, transform_indices = @transform_3, window_bounds = array<i64: 1, 128>}, {pipeline_mode = #tpu.pipeline_mode<synchronous>, transform_indices = @transform_4, window_bounds = array<i64: 128, 128>}, {pipeline_mode = #tpu.pipeline_mode<synchronous>, transform_indices = @transform_5, window_bounds = array<i64: 1, 128>}, {pipeline_mode = #tpu.pipeline_mode<synchronous>, transform_indices = @transform_6, window_bounds = array<i64: 128, 128>}, {pipeline_mode = #tpu.pipeline_mode<synchronous>, transform_indices = @transform_7, window_bounds = array<i64: 128, 128>}, {pipeline_mode = #tpu.pipeline_mode<synchronous>, transform_indices = @transform_8, window_bounds = array<i64: 1, 128>}, {pipeline_mode = #tpu.pipeline_mode<synchronous>, transform_indices = @transform_9, window_bounds = array<i64: 128, 128>}, {pipeline_mode = #tpu.pipeline_mode<synchronous>, transform_indices = @transform_10, window_bounds = array<i64: 1, 128>}, {transform_indices = @transform_11, window_bounds = array<i64: 8, 128>}, {transform_indices = @transform_12, window_bounds = array<i64: 8, 128>}, {transform_indices = @transform_13, window_bounds = array<i64: 8, 128>}]} {
    %c0 = arith.constant 0 : index
    %c0_0 = arith.constant 0 : index
    %0 = vector.load %arg3[%c0, %c0_0] : memref<32x128xbf16, #tpu.memory_space<vmem>>, vector<32x128xbf16>
    %c0_1 = arith.constant 0 : index
    %c0_2 = arith.constant 0 : index
    %1 = vector.load %arg5[%c0_1, %c0_2] : memref<128x128xbf16, #tpu.memory_space<vmem>>, vector<128x128xbf16>
    %c0_3 = arith.constant 0 : index
    %c0_4 = arith.constant 0 : index
    %2 = vector.load %arg4[%c0_3, %c0_4] : memref<1x128xf32, #tpu.memory_space<vmem>>, vector<1x128xf32>
    %c0_5 = arith.constant 0 : index
    %c0_6 = arith.constant 0 : index
    %3 = vector.load %arg6[%c0_5, %c0_6] : memref<1x128xf32, #tpu.memory_space<vmem>>, vector<1x128xf32>
    %c0_7 = arith.constant 0 : index
    %c0_8 = arith.constant 0 : index
    %4 = vector.load %arg1[%c0_7, %c0_8] : memref<8x32xf32, #tpu.memory_space<vmem>>, vector<8x32xf32>
    %5 = arith.truncf %4 : vector<8x32xf32> to vector<8x32xbf16>
    %c0_9 = arith.constant 0 : index
    %c0_10 = arith.constant 0 : index
    %6 = vector.load %arg2[%c0_9, %c0_10] : memref<8x32xf32, #tpu.memory_space<vmem>>, vector<8x32xf32>
    %7 = arith.truncf %6 : vector<8x32xf32> to vector<8x32xbf16>
    %cst = arith.constant dense<0.000000e+00> : vector<8x128xf32>
    %8 = tpu.matmul %5, %0, %cst {dimension_numbers = #tpu.dot_dimension_numbers<[1], [0], [0], [1], [0, 0, 1, 1], [], []>} : vector<8x32xbf16>, vector<32x128xbf16>, vector<8x128xf32> -> vector<8x128xf32>
    %9 = vector.broadcast %2 : vector<1x128xf32> to vector<8x128xf32>
    %10 = arith.addf %8, %9 : vector<8x128xf32>
    %cst_11 = arith.constant 0.000000e+00 : f32
    %11 = vector.broadcast %cst_11 : f32 to vector<8x128xf32>
    %12 = arith.maximumf %10, %11 : vector<8x128xf32>
    %cst_12 = arith.constant dense<0.000000e+00> : vector<8x128xf32>
    %13 = tpu.matmul %7, %0, %cst_12 {dimension_numbers = #tpu.dot_dimension_numbers<[1], [0], [0], [1], [0, 0, 1, 1], [], []>} : vector<8x32xbf16>, vector<32x128xbf16>, vector<8x128xf32> -> vector<8x128xf32>
    %14 = vector.broadcast %2 : vector<1x128xf32> to vector<8x128xf32>
    %15 = arith.addf %13, %14 : vector<8x128xf32>
    %cst_13 = arith.constant 0.000000e+00 : f32
    %16 = vector.broadcast %cst_13 : f32 to vector<8x128xf32>
    %17 = arith.maximumf %15, %16 : vector<8x128xf32>
    %18 = arith.truncf %12 : vector<8x128xf32> to vector<8x128xbf16>
    %cst_14 = arith.constant dense<0.000000e+00> : vector<8x128xf32>
    %19 = tpu.matmul %18, %1, %cst_14 {dimension_numbers = #tpu.dot_dimension_numbers<[1], [0], [0], [1], [0, 0, 1, 1], [], []>} : vector<8x128xbf16>, vector<128x128xbf16>, vector<8x128xf32> -> vector<8x128xf32>
    %20 = vector.broadcast %3 : vector<1x128xf32> to vector<8x128xf32>
    %21 = arith.addf %19, %20 : vector<8x128xf32>
    %22 = arith.truncf %17 : vector<8x128xf32> to vector<8x128xbf16>
    %cst_15 = arith.constant dense<0.000000e+00> : vector<8x128xf32>
    %23 = tpu.matmul %22, %1, %cst_15 {dimension_numbers = #tpu.dot_dimension_numbers<[1], [0], [0], [1], [0, 0, 1, 1], [], []>} : vector<8x128xbf16>, vector<128x128xbf16>, vector<8x128xf32> -> vector<8x128xf32>
    %24 = vector.broadcast %3 : vector<1x128xf32> to vector<8x128xf32>
    %25 = arith.addf %23, %24 : vector<8x128xf32>
    %26 = arith.truncf %21 : vector<8x128xf32> to vector<8x128xbf16>
    %c0_16 = arith.constant 0 : index
    %c0_17 = arith.constant 0 : index
    %27 = vector.load %arg12[%c0_16, %c0_17] : memref<8x128xbf16, #tpu.memory_space<vmem>>, vector<8x128xbf16>
    tpu.vector_store %arg12[%c0_16, %c0_17], %26 {strides = array<i32>} : memref<8x128xbf16, #tpu.memory_space<vmem>>, vector<8x128xbf16>,
    %28 = arith.truncf %25 : vector<8x128xf32> to vector<8x128xbf16>
    %c0_18 = arith.constant 0 : index
    %c0_19 = arith.constant 0 : index
    %29 = vector.load %arg13[%c0_18, %c0_19] : memref<8x128xbf16, #tpu.memory_space<vmem>>, vector<8x128xbf16>
    tpu.vector_store %arg13[%c0_18, %c0_19], %28 {strides = array<i32>} : memref<8x128xbf16, #tpu.memory_space<vmem>>, vector<8x128xbf16>,
    %30 = arith.truncf %21 : vector<8x128xf32> to vector<8x128xbf16>
    %c0_20 = arith.constant 0 : index
    %c0_21 = arith.constant 0 : index
    %31 = vector.load %arg7[%c0_20, %c0_21] : memref<128x128xbf16, #tpu.memory_space<vmem>>, vector<128x128xbf16>
    %cst_22 = arith.constant dense<0.000000e+00> : vector<8x128xf32>
    %32 = tpu.matmul %30, %31, %cst_22 {dimension_numbers = #tpu.dot_dimension_numbers<[1], [0], [0], [1], [0, 0, 1, 1], [], []>} : vector<8x128xbf16>, vector<128x128xbf16>, vector<8x128xf32> -> vector<8x128xf32>
    %33 = arith.truncf %25 : vector<8x128xf32> to vector<8x128xbf16>
    %c0_23 = arith.constant 0 : index
    %c0_24 = arith.constant 0 : index
    %34 = vector.load %arg8[%c0_23, %c0_24] : memref<128x128xbf16, #tpu.memory_space<vmem>>, vector<128x128xbf16>
    %cst_25 = arith.constant dense<0.000000e+00> : vector<8x128xf32>
    %35 = tpu.matmul %33, %34, %cst_25 {dimension_numbers = #tpu.dot_dimension_numbers<[1], [0], [0], [1], [0, 0, 1, 1], [], []>} : vector<8x128xbf16>, vector<128x128xbf16>, vector<8x128xf32> -> vector<8x128xf32>
    %36 = arith.addf %32, %35 : vector<8x128xf32>
    %c0_26 = arith.constant 0 : index
    %c0_27 = arith.constant 0 : index
    %37 = vector.load %arg9[%c0_26, %c0_27] : memref<1x128xf32, #tpu.memory_space<vmem>>, vector<1x128xf32>
    %38 = vector.broadcast %37 : vector<1x128xf32> to vector<8x128xf32>
    %39 = arith.addf %36, %38 : vector<8x128xf32>
    %cst_28 = arith.constant 0.000000e+00 : f32
    %40 = vector.broadcast %cst_28 : f32 to vector<8x128xf32>
    %41 = arith.maximumf %39, %40 : vector<8x128xf32>
    %42 = arith.truncf %41 : vector<8x128xf32> to vector<8x128xbf16>
    %c0_29 = arith.constant 0 : index
    %c0_30 = arith.constant 0 : index
    %43 = vector.load %arg10[%c0_29, %c0_30] : memref<128x128xbf16, #tpu.memory_space<vmem>>, vector<128x128xbf16>
    %cst_31 = arith.constant dense<0.000000e+00> : vector<8x128xf32>
    %44 = tpu.matmul %42, %43, %cst_31 {dimension_numbers = #tpu.dot_dimension_numbers<[1], [0], [0], [1], [0, 0, 1, 1], [], []>} : vector<8x128xbf16>, vector<128x128xbf16>, vector<8x128xf32> -> vector<8x128xf32>
    %c0_32 = arith.constant 0 : index
    %c0_33 = arith.constant 0 : index
    %45 = vector.load %arg11[%c0_32, %c0_33] : memref<1x128xf32, #tpu.memory_space<vmem>>, vector<1x128xf32>
    %46 = vector.broadcast %45 : vector<1x128xf32> to vector<8x128xf32>
    %47 = arith.addf %44, %46 : vector<8x128xf32>
    %48 = arith.negf %47 : vector<8x128xf32>
    %49 = math.exp %48 : vector<8x128xf32>
    %cst_34 = arith.constant 1.000000e+00 : f32
    %50 = vector.broadcast %cst_34 : f32 to vector<8x128xf32>
    %51 = arith.addf %50, %49 : vector<8x128xf32>
    %52 = arith.divf %50, %51 : vector<8x128xf32>
    %53 = arith.truncf %52 : vector<8x128xf32> to vector<8x128xbf16>
    %c0_35 = arith.constant 0 : index
    %c0_36 = arith.constant 0 : index
    %54 = vector.load %arg14[%c0_35, %c0_36] : memref<8x128xbf16, #tpu.memory_space<vmem>>, vector<8x128xbf16>
    tpu.vector_store %arg14[%c0_35, %c0_36], %53 {strides = array<i32>} : memref<8x128xbf16, #tpu.memory_space<vmem>>, vector<8x128xbf16>,
    return
  }
  func.func @transform_0(%arg0: i32) -> (i32, i32) {
    %c0_i32 = arith.constant 0 : i32
    %c0_i32_0 = arith.constant 0 : i32
    return %arg0, %c0_i32 : i32, i32
  }
  func.func @transform_1(%arg0: i32) -> (i32, i32) {
    %c0_i32 = arith.constant 0 : i32
    %c0_i32_0 = arith.constant 0 : i32
    return %arg0, %c0_i32 : i32, i32
  }
  func.func @transform_2(%arg0: i32) -> (i32, i32) {
    %c0_i32 = arith.constant 0 : i32
    %c0_i32_0 = arith.constant 0 : i32
    %c0_i32_1 = arith.constant 0 : i32
    return %c0_i32, %c0_i32_0 : i32, i32
  }
  func.func @transform_3(%arg0: i32) -> (i32, i32) {
    %c0_i32 = arith.constant 0 : i32
    %c0_i32_0 = arith.constant 0 : i32
    %c0_i32_1 = arith.constant 0 : i32
    return %c0_i32, %c0_i32_0 : i32, i32
  }
  func.func @transform_4(%arg0: i32) -> (i32, i32) {
    %c0_i32 = arith.constant 0 : i32
    %c0_i32_0 = arith.constant 0 : i32
    %c0_i32_1 = arith.constant 0 : i32
    return %c0_i32, %c0_i32_0 : i32, i32
  }
  func.func @transform_5(%arg0: i32) -> (i32, i32) {
    %c0_i32 = arith.constant 0 : i32
    %c0_i32_0 = arith.constant 0 : i32
    %c0_i32_1 = arith.constant 0 : i32
    return %c0_i32, %c0_i32_0 : i32, i32
  }
  func.func @transform_6(%arg0: i32) -> (i32, i32) {
    %c0_i32 = arith.constant 0 : i32
    %c0_i32_0 = arith.constant 0 : i32
    %c0_i32_1 = arith.constant 0 : i32
    return %c0_i32, %c0_i32_0 : i32, i32
  }
  func.func @transform_7(%arg0: i32) -> (i32, i32) {
    %c0_i32 = arith.constant 0 : i32
    %c0_i32_0 = arith.constant 0 : i32
    %c0_i32_1 = arith.constant 0 : i32
    return %c0_i32, %c0_i32_0 : i32, i32
  }
  func.func @transform_8(%arg0: i32) -> (i32, i32) {
    %c0_i32 = arith.constant 0 : i32
    %c0_i32_0 = arith.constant 0 : i32
    %c0_i32_1 = arith.constant 0 : i32
    return %c0_i32, %c0_i32_0 : i32, i32
  }
  func.func @transform_9(%arg0: i32) -> (i32, i32) {
    %c0_i32 = arith.constant 0 : i32
    %c0_i32_0 = arith.constant 0 : i32
    %c0_i32_1 = arith.constant 0 : i32
    return %c0_i32, %c0_i32_0 : i32, i32
  }
  func.func @transform_10(%arg0: i32) -> (i32, i32) {
    %c0_i32 = arith.constant 0 : i32
    %c0_i32_0 = arith.constant 0 : i32
    %c0_i32_1 = arith.constant 0 : i32
    return %c0_i32, %c0_i32_0 : i32, i32
  }
  func.func @transform_11(%arg0: i32) -> (i32, i32) {
    %c0_i32 = arith.constant 0 : i32
    %c0_i32_0 = arith.constant 0 : i32
    return %arg0, %c0_i32 : i32, i32
  }
  func.func @transform_12(%arg0: i32) -> (i32, i32) {
    %c0_i32 = arith.constant 0 : i32
    %c0_i32_0 = arith.constant 0 : i32
    return %arg0, %c0_i32 : i32, i32
  }
  func.func @transform_13(%arg0: i32) -> (i32, i32) {
    %c0_i32 = arith.constant 0 : i32
    %c0_i32_0 = arith.constant 0 : i32
    return %arg0, %c0_i32 : i32, i32
  }
}

</mosaic_0001>

<bundles_post_ra>
// kernel: encoder_trainer_forward.1
= control target key start
LH: loop header
LB: loop body
LE: loop exit
PB: predicated region body
PF: predicated region fallthrough
CT: control target
= control target key end

     0   :  { %19 = vsyncpa [#allocation3], 0  ;;  %s1333_s0 = inlined_call_operand.vmem [shape: f32[8,32], index: 0, kind: input, shape index: {}]   ;;  %s1334_s1 = inlined_call_operand.vmem [shape: f32[8,32], index: 1, kind: input, shape index: {}]   ;;  %s1335_s2 = inlined_call_operand.hbm [shape: bf16[32,128], index: 2, kind: input, shape index: {}]   ;;  %s1336_s3 = inlined_call_operand.vmem [shape: f32[1,128], index: 3, kind: input, shape index: {}]   ;;  %s1337_s4 = inlined_call_operand.hbm [shape: bf16[128,128], index: 4, kind: input, shape index: {}]   ;;  %s1338_s5 = inlined_call_operand.vmem [shape: f32[1,128], index: 5, kind: input, shape index: {}]   ;;  %s1339_s6 = inlined_call_operand.vmem [shape: bf16[128,128], index: 6, kind: input, shape index: {}]   ;;  %s1340_s7 = inlined_call_operand.hbm [shape: bf16[128,128], index: 7, kind: input, shape index: {}]   ;;  %s1341_s8 = inlined_call_operand.vmem [shape: f32[1,128], index: 8, kind: input, shape index: {}]   ;;  %s1342_s9 = inlined_call_operand.hbm [shape: bf16[128,128], index: 9, kind: input, shape index: {}]   ;;  %s1343_s10 = inlined_call_operand.vmem [shape: f32[1,128], index: 10, kind: input, shape index: {}]   ;;  %s1344_s11 = inlined_call_operand.vmem [shape: bf16[8,128], index: 11, kind: output, shape index: {0}]   ;;  %s1345_s12 = inlined_call_operand.vmem [shape: bf16[8,128], index: 12, kind: output, shape index: {1}]   ;;  %s1346_s13 = inlined_call_operand.vmem [shape: bf16[8,128], index: 13, kind: output, shape index: {2}]  }
   0x1   :  { %20 = vsyncpa [#allocation5], 0 }
   0x2   :  { %21 = vsyncpa [#allocation8], 0  ;;  %s1070_s25 = smov [#allocation4]   ;;  %s1071_s27 = smov [#allocation2]  }
   0x3   :  { %s45_s26 = sshll.u32 %s1070_s25, 4  ;;  %s31_s28 = sshll.u32 %s1071_s27, 4  ;;  %s46_s26 = int_to_ptr.vmem [resolvable:$true] %s45_s26  ;;  %s1148_s28 = int_to_ptr.vmem [resolvable:$true] %s31_s28 }
   0x4   :  { %s976_s14 = scalar_lea.hbm %s1337_s4, 1024 }
   0x5   :  { %p977_p0 = scmp.ne.s32.totalorder %s1337_s4, %s976_s14  ;;  %p980_p1 = scmp.lt.u32.totalorder %s976_s14, %s1337_s4 }
   0x7   :  { %p982_p2 = pnand %p980_p1, %p977_p0 }
   0x9   :  { %985 = shalt.err (!%p982_p2)
}
   0xa   :  { %s986_s19 = scalar_lea.vmem %s46_s26, 1024  ;;  %p991_p4 = scmp.lt.s32.totalorder %s46_s26, %s46_s26 }
   0xb   :  { %p987_p3 = scmp.ne.s32.totalorder %s46_s26, %s986_s19  ;;  %p992_p5 = scmp.lt.s32.totalorder %s986_s19, %s986_s19 }
   0xd   :  { %p993_p6 = por %p992_p5, %p991_p4 }
   0xf   :  { %p994_p7 = pnand %p993_p6, %p987_p3 }
  0x11   :  { %997 = shalt.err (!%p994_p7)
}
  0x12   :  { %s1072_s20 = smov 64   ;;  %s1073_s21 = smov 4  }
  0x13   :  { %51 = dma.hbm_to_vmem [thread:$0]  %s1337_s4, 1024, %s46_s26, [#allocation5], %s1072_s20, %s1072_s20, %s1073_s21  }
  0x14   :  { %s998_s27 = scalar_lea.hbm %s1335_s2, 256 }
  0x15   :  { %p999_p8 = scmp.ne.s32.totalorder %s1335_s2, %s998_s27  ;;  %p1002_p9 = scmp.lt.u32.totalorder %s998_s27, %s1335_s2 }
  0x17   :  { %p1004_p10 = pnand %p1002_p9, %p999_p8 }
  0x19   :  { %1007 = shalt.err (!%p1004_p10)
}
  0x1a   :  { %s1008_s16 = scalar_lea.vmem %s1148_s28, 256  ;;  %p1013_p12 = scmp.lt.s32.totalorder %s1148_s28, %s1148_s28 }
  0x1b   :  { %p1009_p11 = scmp.ne.s32.totalorder %s1148_s28, %s1008_s16  ;;  %p1014_p13 = scmp.lt.s32.totalorder %s1008_s16, %s1008_s16 }
  0x1d   :  { %p1015_p0 = por %p1014_p13, %p1013_p12 }
  0x1f   :  { %p1016_p1 = pnand %p1015_p0, %p1009_p11 }
  0x21   :  { %1019 = shalt.err (!%p1016_p1)
}
  0x22   :  { %37 = dma.hbm_to_vmem [thread:$0]  %s1335_s2, 256, %s1148_s28, [#allocation3], %s1072_s20, %s1072_s20, %s1073_s21  }
  0x23   :  { %s1074_s17 = smov [#allocation6]   ;;  %s1075_s19 = smov [#allocation7]  }
  0x24   :  { %s61_s18 = sshll.u32 %s1074_s17, 4  ;;  %s75_s22 = sshll.u32 %s1075_s19, 4  ;;  %s62_s18 = int_to_ptr.vmem [resolvable:$true] %s61_s18  ;;  %s1185_s22 = int_to_ptr.vmem [resolvable:$true] %s75_s22 }
  0x25   :  { %s1020_s25 = scalar_lea.hbm %s1340_s7, 1024 }
  0x26   :  { %p1021_p2 = scmp.ne.s32.totalorder %s1340_s7, %s1020_s25  ;;  %p1024_p3 = scmp.lt.u32.totalorder %s1020_s25, %s1340_s7 }
  0x28   :  { %p1026_p4 = pnand %p1024_p3, %p1021_p2 }
  0x2a   :  { %1029 = shalt.err (!%p1026_p4)
}
  0x2b   :  { %s1030_s2 = scalar_lea.vmem %s62_s18, 1024  ;;  %p1035_p6 = scmp.lt.s32.totalorder %s62_s18, %s62_s18 }
  0x2c   :  { %p1031_p5 = scmp.ne.s32.totalorder %s62_s18, %s1030_s2  ;;  %p1036_p7 = scmp.lt.s32.totalorder %s1030_s2, %s1030_s2 }
  0x2e   :  { %p1037_p8 = por %p1036_p7, %p1035_p6 }
  0x30   :  { %p1038_p9 = pnand %p1037_p8, %p1031_p5 }
  0x32   :  { %1041 = shalt.err (!%p1038_p9)
}
  0x33   :  { %67 = dma.hbm_to_vmem [thread:$0]  %s1340_s7, 1024, %s62_s18, [#allocation5], %s1072_s20, %s1072_s20, %s1073_s21  }
  0x34   :  { %s1042_s26 = scalar_lea.hbm %s1342_s9, 1024 }
  0x35   :  { %p1043_p10 = scmp.ne.s32.totalorder %s1342_s9, %s1042_s26  ;;  %p1046_p11 = scmp.lt.u32.totalorder %s1042_s26, %s1342_s9 }
  0x37   :  { %p1048_p12 = pnand %p1046_p11, %p1043_p10 }
  0x39   :  { %1051 = shalt.err (!%p1048_p12)
}
  0x3a   :  { %s1052_s25 = scalar_lea.vmem %s1185_s22, 1024  ;;  %p1057_p0 = scmp.lt.s32.totalorder %s1185_s22, %s1185_s22 }
  0x3b   :  { %p1053_p13 = scmp.ne.s32.totalorder %s1185_s22, %s1052_s25  ;;  %p1058_p1 = scmp.lt.s32.totalorder %s1052_s25, %s1052_s25 }
  0x3d   :  { %p1059_p2 = por %p1058_p1, %p1057_p0 }
  0x3f   :  { %p1060_p3 = pnand %p1059_p2, %p1053_p13 }
  0x41   :  { %1063 = shalt.err (!%p1060_p3)
}
  0x42   :  { %81 = dma.hbm_to_vmem [thread:$0]  %s1342_s9, 1024, %s1185_s22, [#allocation8], %s1072_s20, %s1072_s20, %s1073_s21  }
  0x43   :  { %1064 = dma.done.wait [#allocation3], 256  }
  0x44   :  { %1065 = vsyncadd [#allocation3], 4294967040 }
  0x45   :  { %1066 = dma.done.wait [#allocation5], 2048  }
  0x46   :  { %1067 = vsyncadd [#allocation5], 4294965248 }
  0x47   :  { %1068 = dma.done.wait [#allocation8], 1024  }
  0x48   :  { %1069 = vsyncadd [#allocation8], 4294966272  ;;  %v1076_v0 = vmov 0.0   ;;  %vm1077_vm0 = vmmov 0   ;;  %v938_v1 = vld [vmem:[#allocation2] sm:$0xff]   ;;  %v939_v2 = vld [vmem:[#allocation2 + $0x8] sm:$0xff]  }
  0x49   :  { %814 = vmatprep.subr.bf16.mxu1 %v1076_v0  ;;  %818 = vmatprep.mubr.msk.bf16.mxu1 %vm1077_vm0, %v1076_v0  ;;  %v119_v3 = vld [vmem:[%s1333_s0] sm:$0xff]  ;;  %v940_v4 = vld [vmem:[#allocation4] sm:$0xff]   ;;  %vm141_vm1 = vcmask 261120   ;;  %v942_v8 = vld [vmem:[#allocation4 + $0x10] sm:$0xff]  }
  0x4a   :  { %830 = vmatprep.subr.bf16.mxu0 %v1076_v0  ;;  %846 = vmatprep.mubr.msk.bf16.mxu0 %vm1077_vm0, %v1076_v0  ;;  %v120_v5 = vpack.c.bf16 %v119_v3, %v119_v3  ;;  %v941_v6 = vld [vmem:[#allocation4 + $0x8] sm:$0xff]   ;;  %v943_v9 = vld [vmem:[#allocation4 + $0x18] sm:$0xff]   ;;  %v944_v11 = vld [vmem:[#allocation4 + $0x20] sm:$0xff]  }
  0x4b   :  { %815 = vmatpush3.bf16.msra.mxu1 %v938_v1  ;;  %831 = vmatpush3.bf16.msra.mxu0 %v940_v4  ;;  %v121_v7 = vld [vmem:[%s1334_s1] sm:$0xff]  ;;  %v946_v13 = vld [vmem:[#allocation4 + $0x30] sm:$0xff]   ;;  %v947_v14 = vld [vmem:[#allocation4 + $0x38] sm:$0xff]  }
  0x4c   :  { %816 = vmatprep.subr.bf16.mxu1 %v1076_v0  ;;  %832 = vmatprep.subr.bf16.mxu0 %v1076_v0  ;;  %v122_v10 = vpack.c.bf16 %v121_v7, %v121_v7  ;;  %v945_v12 = vld [vmem:[#allocation4 + $0x28] sm:$0xff]   ;;  %v950_v22 = vld [vmem:[#allocation6] sm:$0xff]   ;;  %v954_v32 = vld [vmem:[#allocation6 + $0x10] sm:$0xff]  }
  0x4d   :  { %v722_v15 = vld [vmem:[%s1336_s3] ss:$0 sm:$0xff]  ;;  %v949_v34 = vld [vmem:[%s1339_s6 + $0x8] sm:$0xff]   ;;  %v956_v35 = vld [vmem:[#allocation6 + $0x18] sm:$0xff]  }
  0x4e   :  { %v952_v25 = vld [vmem:[#allocation6 + $0x8] sm:$0xff]   ;;  %v951_v36 = vld [vmem:[%s1339_s6 + $0x10] sm:$0xff]   ;;  %v958_v37 = vld [vmem:[#allocation6 + $0x20] sm:$0xff]  }
  0x4f   :  { %817 = vmatpush3.bf16.msra.mxu1 %v939_v2  ;;  %833 = vmatpush3.bf16.msra.mxu0 %v941_v6  ;;  %v948_v31 = vld [vmem:[%s1339_s6] sm:$0xff]   ;;  %v953_v38 = vld [vmem:[%s1339_s6 + $0x18] sm:$0xff]   ;;  %v957_v40 = vld [vmem:[%s1339_s6 + $0x28] sm:$0xff]  }
  0x50   :  { %822 = vmatprep.subr.bf16.mxu1 %v1076_v0  ;;  %834 = vmatprep.subr.bf16.mxu0 %v1076_v0  ;;  %v955_v39 = vld [vmem:[%s1339_s6 + $0x20] sm:$0xff]   ;;  %v959_v41 = vld [vmem:[%s1339_s6 + $0x30] sm:$0xff]   ;;  %v961_v43 = vld [vmem:[%s1339_s6 + $0x38] sm:$0xff]  }
  0x51   :  { %v960_v42 = vld [vmem:[#allocation6 + $0x28] sm:$0xff]   ;;  %v962_v44 = vld [vmem:[#allocation6 + $0x30] sm:$0xff]   ;;  %v963_v45 = vld [vmem:[#allocation6 + $0x38] sm:$0xff]  }
  0x52   :  { %819 = vmatmul.mubr.msk.bf16.vlgmr.msra.gmra.mrb[0].mxu1 %vm141_vm1, %v120_v5  ;;  %v727_v46 = vld [vmem:[%s1338_s5] ss:$0 sm:$0xff]  ;;  %v964_v57 = vld [vmem:[#allocation7] sm:$0xff]   ;;  %v966_v61 = vld [vmem:[#allocation7 + $0x10] sm:$0xff]  }
  0x53   :  { %823 = vmatpush3.bf16.msra.mxu1 %v938_v1  ;;  %826 = vmatprep.mubr.msk.bf16.mxu1 %vm1077_vm0, %v1076_v0  ;;  %v965_v60 = vld [vmem:[#allocation7 + $0x8] sm:$0xff]   ;;  %v967_v62 = vld [vmem:[#allocation7 + $0x18] sm:$0xff]   ;;  %v968_v63 = vld [vmem:[#allocation7 + $0x20] sm:$0xff]  }
  0x54   :  { %824 = vmatprep.subr.bf16.mxu1 %v1076_v0  ;;  %835 = vmatpush3.bf16.msra.mxu0 %v942_v8  ;;  %v969_v1 = vld [vmem:[#allocation7 + $0x28] sm:$0xff]   ;;  %v971_v3 = vld [vmem:[#allocation7 + $0x38] sm:$0xff]  }
  0x55   :  { %836 = vmatprep.subr.bf16.mxu0 %v1076_v0 }
  0x57   :  { %825 = vmatpush3.bf16.msra.mxu1 %v939_v2  ;;  %v970_v2 = vld [vmem:[#allocation7 + $0x30] sm:$0xff]  }
  0x58   :  { %850 = vmatprep.subr.bf16.mxu1 %v1076_v0  ;;  %837 = vmatpush3.bf16.msra.mxu0 %v943_v9 }
  0x59   :  { %838 = vmatprep.subr.bf16.mxu0 %v1076_v0 }
  0x5a   :  { %827 = vmatmul.mubr.msk.bf16.vlgmr.msra.gmra.mrb[4].mxu1 %vm141_vm1, %v122_v10 }
  0x5b   :  { %851 = vmatpush3.bf16.msra.mxu1 %v940_v4  ;;  %866 = vmatprep.mubr.msk.bf16.mxu1 %vm1077_vm0, %v1076_v0 }
  0x5c   :  { %852 = vmatprep.subr.bf16.mxu1 %v1076_v0  ;;  %839 = vmatpush3.bf16.msra.mxu0 %v944_v11 }
  0x5d   :  { %840 = vmatprep.subr.bf16.mxu0 %v1076_v0 }
  0x5f   :  { %853 = vmatpush3.bf16.msra.mxu1 %v941_v6 }
  0x60   :  { %854 = vmatprep.subr.bf16.mxu1 %v1076_v0  ;;  %841 = vmatpush3.bf16.msra.mxu0 %v945_v12 }
  0x61   :  { %842 = vmatprep.subr.bf16.mxu0 %v1076_v0 }
  0x63   :  { %855 = vmatpush3.bf16.msra.mxu1 %v942_v8 }
  0x64   :  { %856 = vmatprep.subr.bf16.mxu1 %v1076_v0  ;;  %843 = vmatpush3.bf16.msra.mxu0 %v946_v13 }
  0x65   :  { %844 = vmatprep.subr.bf16.mxu0 %v1076_v0 }
  0x67   :  { %857 = vmatpush3.bf16.msra.mxu1 %v943_v9  ;;  %v752_v9 = vld [vmem:[%s1341_s8] ss:$0 sm:$0xff] }
  0x68   :  { %858 = vmatprep.subr.bf16.mxu1 %v1076_v0  ;;  %845 = vmatpush3.bf16.msra.mxu0 %v947_v14 }
  0x69   :  { %870 = vmatprep.subr.bf16.mxu0 %v1076_v0 }
  0x6b   :  { %859 = vmatpush3.bf16.msra.mxu1 %v944_v11 }
  0x6c   :  { %860 = vmatprep.subr.bf16.mxu1 %v1076_v0 }
  0x6f   :  { %861 = vmatpush3.bf16.msra.mxu1 %v945_v12 }
  0x70   :  { %862 = vmatprep.subr.bf16.mxu1 %v1076_v0 }
  0x73   :  { %863 = vmatpush3.bf16.msra.mxu1 %v946_v13 }
  0x74   :  { %864 = vmatprep.subr.bf16.mxu1 %v1076_v0 }
  0x77   :  { %865 = vmatpush3.bf16.msra.mxu1 %v947_v14 }
  0x78   :  { %890 = vmatprep.subr.bf16.mxu1 %v1076_v0 }
 0x125   :  { %v179_v16 = vpop.f32.mrb[0].mxu1 }
 0x126   :  { %v180_v17 = vadd.f32 %v722_v15, %v179_v16  ;;  %v820_v18 = vpop.f32.mrb[1].mxu1 }
 0x127   :  { %v182_v19 = vpop.f32.mrb[2].mxu1 }
 0x128   :  { %v185_v20 = vmax.f32 %v180_v17, 0.0  ;;  %v821_v21 = vpop.f32.mrb[3].mxu1 }
 0x12a   :  { %v230_v23 = vpack.c.bf16 %v185_v20, %v185_v20 }
 0x12c   :  { %847 = vmatmul.mubr.bf16.vlgmr.msra.gmra.mrb[0].mxu0 %v230_v23 }
 0x12d   :  { %v223_v24 = vpop.f32.mrb[4].mxu1  ;;  %871 = vmatpush3.bf16.msra.mxu0 %v950_v22  ;;  %886 = vmatprep.mubr.msk.bf16.mxu0 %vm1077_vm0, %v1076_v0 }
 0x12e   :  { %v224_v26 = vadd.f32 %v722_v15, %v223_v24  ;;  %v828_v27 = vpop.f32.mrb[5].mxu1  ;;  %872 = vmatprep.subr.bf16.mxu0 %v1076_v0 }
 0x12f   :  { %v226_v28 = vpop.f32.mrb[6].mxu1 }
 0x130   :  { %v229_v29 = vmax.f32 %v224_v26, 0.0  ;;  %v829_v30 = vpop.f32.mrb[7].mxu1 }
 0x131   :  { %873 = vmatpush3.bf16.msra.mxu0 %v952_v25 }
 0x132   :  { %v325_v33 = vpack.c.bf16 %v229_v29, %v229_v29  ;;  %874 = vmatprep.subr.bf16.mxu0 %v1076_v0 }
 0x134   :  { %867 = vmatmul.mubr.bf16.vlgmr.msra.gmra.mrb[8].mxu1 %v325_v33 }
 0x135   :  { %891 = vmatpush3.bf16.msra.mxu1 %v948_v31  ;;  %875 = vmatpush3.bf16.msra.mxu0 %v954_v32 }
 0x136   :  { %892 = vmatprep.subr.bf16.mxu1 %v1076_v0  ;;  %876 = vmatprep.subr.bf16.mxu0 %v1076_v0 }
 0x137   :  { %906 = vmatprep.mubr.msk.bf16.mxu1 %vm1077_vm0, %v1076_v0 }
 0x139   :  { %893 = vmatpush3.bf16.msra.mxu1 %v949_v34  ;;  %877 = vmatpush3.bf16.msra.mxu0 %v956_v35 }
 0x13a   :  { %894 = vmatprep.subr.bf16.mxu1 %v1076_v0  ;;  %878 = vmatprep.subr.bf16.mxu0 %v1076_v0 }
 0x13d   :  { %895 = vmatpush3.bf16.msra.mxu1 %v951_v36  ;;  %879 = vmatpush3.bf16.msra.mxu0 %v958_v37 }
 0x13e   :  { %896 = vmatprep.subr.bf16.mxu1 %v1076_v0  ;;  %880 = vmatprep.subr.bf16.mxu0 %v1076_v0 }
 0x141   :  { %897 = vmatpush3.bf16.msra.mxu1 %v953_v38  ;;  %881 = vmatpush3.bf16.msra.mxu0 %v960_v42 }
 0x142   :  { %898 = vmatprep.subr.bf16.mxu1 %v1076_v0  ;;  %882 = vmatprep.subr.bf16.mxu0 %v1076_v0 }
 0x145   :  { %899 = vmatpush3.bf16.msra.mxu1 %v955_v39  ;;  %883 = vmatpush3.bf16.msra.mxu0 %v962_v44 }
 0x146   :  { %900 = vmatprep.subr.bf16.mxu1 %v1076_v0  ;;  %884 = vmatprep.subr.bf16.mxu0 %v1076_v0 }
 0x149   :  { %901 = vmatpush3.bf16.msra.mxu1 %v957_v40  ;;  %885 = vmatpush3.bf16.msra.mxu0 %v963_v45 }
 0x14a   :  { %902 = vmatprep.subr.bf16.mxu1 %v1076_v0  ;;  %910 = vmatprep.subr.bf16.mxu0 %v1076_v0 }
 0x14d   :  { %903 = vmatpush3.bf16.msra.mxu1 %v959_v41 }
 0x14e   :  { %904 = vmatprep.subr.bf16.mxu1 %v1076_v0 }
 0x151   :  { %905 = vmatpush3.bf16.msra.mxu1 %v961_v43 }
 0x1ff   :  { %v319_v47 = vpop.f32.mrb[0].mxu0 }
 0x200   :  { %v320_v48 = vadd.f32 %v727_v46, %v319_v47  ;;  %v848_v49 = vpop.f32.mrb[1].mxu0 }
 0x201   :  { %v322_v50 = vpop.f32.mrb[2].mxu0 }
 0x202   :  { %v366_v51 = vpack.c.bf16 %v320_v48, %v320_v48  ;;  %v849_v52 = vpop.f32.mrb[3].mxu0 }
 0x204   :  { %367 = vst [vmem:[%s1344_s11] sm:$0xf] %v366_v51  ;;  %907 = vmatmul.mubr.bf16.vlgmr.msra.gmra.mrb[12].mxu1 %v366_v51 }
 0x207   :  { %v360_v53 = vpop.f32.mrb[8].mxu1 }
 0x208   :  { %v361_v54 = vadd.f32 %v727_v46, %v360_v53  ;;  %v868_v55 = vpop.f32.mrb[9].mxu1 }
 0x209   :  { %v363_v56 = vpop.f32.mrb[10].mxu1 }
 0x20a   :  { %v368_v58 = vpack.c.bf16 %v361_v54, %v361_v54  ;;  %v869_v59 = vpop.f32.mrb[11].mxu1 }
 0x20c   :  { %369 = vst [vmem:[%s1345_s12] sm:$0xf] %v368_v58  ;;  %887 = vmatmul.mubr.bf16.vlgmr.msra.gmra.mrb[4].mxu0 %v368_v58 }
 0x20d   :  { %911 = vmatpush3.bf16.msra.mxu0 %v964_v57  ;;  %926 = vmatprep.mubr.msk.bf16.mxu0 %vm1077_vm0, %v1076_v0 }
 0x20e   :  { %912 = vmatprep.subr.bf16.mxu0 %v1076_v0 }
 0x211   :  { %913 = vmatpush3.bf16.msra.mxu0 %v965_v60 }
 0x212   :  { %914 = vmatprep.subr.bf16.mxu0 %v1076_v0 }
 0x215   :  { %915 = vmatpush3.bf16.msra.mxu0 %v966_v61 }
 0x216   :  { %916 = vmatprep.subr.bf16.mxu0 %v1076_v0 }
 0x219   :  { %917 = vmatpush3.bf16.msra.mxu0 %v967_v62 }
 0x21a   :  { %918 = vmatprep.subr.bf16.mxu0 %v1076_v0 }
 0x21d   :  { %919 = vmatpush3.bf16.msra.mxu0 %v968_v63 }
 0x21e   :  { %920 = vmatprep.subr.bf16.mxu0 %v1076_v0 }
 0x221   :  { %921 = vmatpush3.bf16.msra.mxu0 %v969_v1 }
 0x222   :  { %922 = vmatprep.subr.bf16.mxu0 %v1076_v0 }
 0x225   :  { %923 = vmatpush3.bf16.msra.mxu0 %v970_v2 }
 0x226   :  { %924 = vmatprep.subr.bf16.mxu0 %v1076_v0  ;;  %v753_v0 = vld [vmem:[%s1343_s10] ss:$0 sm:$0xff] }
 0x229   :  { %925 = vmatpush3.bf16.msra.mxu0 %v971_v3 }
 0x2d7   :  { %v572_v4 = vpop.f32.mrb[12].mxu1 }
 0x2d8   :  { %v908_v5 = vpop.f32.mrb[13].mxu1 }
 0x2d9   :  { %v575_v6 = vpop.f32.mrb[14].mxu1 }
 0x2da   :  { %v909_v7 = vpop.f32.mrb[15].mxu1 }
 0x2df   :  { %v484_v8 = vpop.f32.mrb[4].mxu0 }
 0x2e0   :  { %v573_v10 = vadd.f32 %v572_v4, %v484_v8  ;;  %v888_v11 = vpop.f32.mrb[5].mxu0 }
 0x2e1   :  { %v487_v12 = vpop.f32.mrb[6].mxu0 }
 0x2e2   :  { %v585_v13 = vadd.f32 %v752_v9, %v573_v10  ;;  %v889_v14 = vpop.f32.mrb[7].mxu0 }
 0x2e4   :  { %v586_v15 = vmax.f32 %v585_v13, 0.0 }
 0x2e6   :  { %v587_v16 = vpack.c.bf16 %v586_v15, %v586_v15 }
 0x2e8   :  { %927 = vmatmul.mubr.bf16.vlgmr.msra.gmra.mrb[8].mxu0 %v587_v16 }
 0x3bb   :  { %v693_v17 = vpop.f32.mrb[8].mxu0 }
 0x3bc   :  { %v694_v18 = vadd.f32 %v753_v0, %v693_v17  ;;  %v928_v19 = vpop.f32.mrb[9].mxu0 }
 0x3bd   :  { %v696_v20 = vpop.f32.mrb[10].mxu0 }
 0x3be   :  { %v762_v21 = vmul.f32 -1.442695, %v694_v18  ;;  %v929_v22 = vpop.f32.mrb[11].mxu0 }
 0x3c0   :  { %972 = vpow2.f32 %v762_v21 }
 0x3ca   :  { %v973_v23 = vpop.eup %972 }
 0x3cb   :  { %v702_v24 = vadd.f32 1.0, %v973_v23 }
 0x3cd   :  { %974 = vrcp.f32 %v702_v24 }
 0x3d7   :  { %v975_v25 = vpop.eup %974 }
 0x3d8   :  { %v705_v26 = vpack.c.bf16 %v975_v25, %v975_v25 }
 0x3da   :  { %706 = vst [vmem:[%s1346_s13] sm:$0xf] %v705_v26 }
 0x3db   :  { %719 = vsyncpa [#allocation3], 1 }
 0x3dc   :  { %720 = vsyncpa [#allocation5], 1 }
 0x3dd   :  { %721 = vsyncpa [#allocation8], 1 }

</bundles_post_ra>
